<compile_context>
chip_gen: v7x
topology: tpu7x:2x2x1
jax: 0.10.0
libtpu: 0.0.40
codegen_flags: <defaults>
</compile_context>

<pallas_src>
import functools

import jax
import jax.numpy as jnp
from jax.experimental import pallas as pl
from jax.experimental.pallas import tpu as pltpu

LANES = 128
SUBLANES = 8
CHUNK_ROWS = 256                       # rows streamed per inner step
VMEM_LIMIT_BYTES = 48 * 1024 * 1024    # < 64 MiB physical on every generation


def _num_tensorcores():
    """Best-effort TensorCore count per chip (2 on v7x, else 1); fallback 1."""
    try:
        info = pltpu.get_tpu_info()
        for name in ("num_cores", "core_count", "num_tensorcores",
                     "tensorcores_per_chip"):
            v = getattr(info, name, None)
            if isinstance(v, int) and v >= 1:
                return v
    except Exception:
        pass
    try:
        kind = jax.devices()[0].device_kind.lower()
        if "v7" in kind or "7x" in kind:
            return 2
    except Exception:
        pass
    return 1


def _modulating_factor(b, gamma):
    # (1 - p_t) ** gamma with cheap EUP-friendly special cases; b clamped >= 0.
    if gamma == 0.0:
        return jnp.ones_like(b)
    if gamma == 0.5:
        return jnp.sqrt(b)
    if gamma == 1.0:
        return b
    if gamma == 1.5:
        return b * jnp.sqrt(b)
    if gamma == 2.0:
        return b * b
    return jnp.power(b, gamma)


def _focal_loss_kernel(pred_ref, true_ref, out_ref, *, gamma, alpha, row_tile,
                       part_stride, row_boundary, total_rows, need_mask):
    c = pl.program_id(0)   # partial-sum index (one per TensorCore on v7x)
    i = pl.program_id(1)   # reduction step along the rows owned by this partial

    @pl.when(i == 0)
    def _():
        out_ref[...] = jnp.zeros_like(out_ref)

    blk = c * part_stride + i
    block_row0 = blk * row_tile

    def chunk_partial_sum(r0, n_rows, mask_bounds):
        # r0 / n_rows are static Python ints -> aligned static VMEM sub-slices.
        x = pred_ref[pl.ds(r0, n_rows), :].astype(jnp.float32)
        t = true_ref[pl.ds(r0, n_rows), :].astype(jnp.float32)

        # Numerically stable BCE-with-logits sharing a single exp with sigmoid.
        e = jnp.exp(-jnp.abs(x))
        bce = jnp.maximum(x, 0.0) - x * t + jnp.log1p(e)

        # sigmoid(x): x>=0 -> 1/(1+e), x<0 -> e/(1+e).  EUP approx reciprocal
        # seed + one Newton step keeps accuracy while staying off the VALU-heavy
        # exact-divide lowering.
        d = 1.0 + e
        r = pl.reciprocal(d, approx=True)
        r = r * (2.0 - d * r)
        p = jnp.where(x >= 0.0, 1.0, e) * r

        # b = 1 - p_t = p + t - 2*t*p ; alpha_factor = (1-a) + t*(2a-1).
        b = jnp.maximum(p + t - 2.0 * (t * p), 0.0)
        alpha_factor = (1.0 - alpha) + t * (2.0 * alpha - 1.0)
        loss = bce * alpha_factor * _modulating_factor(b, gamma)

        if mask_bounds is not None:
            # Select (not multiply-by-mask) so garbage rows (ragged boundary
            # DMA / the other partial's overlap block) never propagate NaN/Inf.
            lo, hi = mask_bounds
            rows = (block_row0 + r0) + jax.lax.broadcasted_iota(
                jnp.int32, loss.shape, 0)
            loss = jnp.where((rows >= lo) & (rows < hi), loss, 0.0)

        # Fold the chunk down to one (8, 128) vreg with pure VPU adds.
        return loss.reshape(n_rows // SUBLANES, SUBLANES, LANES).sum(axis=0)

    chunk = min(CHUNK_ROWS, row_tile)
    n_full = row_tile // chunk
    tail = row_tile % chunk

    def tile_partial_sum(mask_bounds):
        acc = jnp.zeros((SUBLANES, LANES), jnp.float32)
        for k in range(n_full):                    # static trip count
            acc = acc + chunk_partial_sum(k * chunk, chunk, mask_bounds)
        if tail:
            acc = acc + chunk_partial_sum(n_full * chunk, tail, mask_bounds)
        return acc

    if need_mask:
        # Edge blocks: rows outside [lo, hi) must be dropped.  Only those
        # blocks pay for the iota/compare/select; interior blocks are mask-free.
        lo = c * row_boundary
        hi = jnp.minimum((c + 1) * row_boundary, total_rows)
        is_edge = (block_row0 < lo) | (block_row0 + row_tile > hi)

        @pl.when(is_edge)
        def _():
            out_ref[...] += tile_partial_sum((lo, hi))

        @pl.when(jnp.logical_not(is_edge))
        def _():
            out_ref[...] += tile_partial_sum(None)
    else:
        out_ref[...] += tile_partial_sum(None)


def focal_loss(pred, true, *, gamma=1.5, alpha=0.25, reduction="mean",
               num_partials=None):
    """Focal loss over logits `pred` and targets `true` (same shape, NCHW ok)."""
    assert pred.shape == true.shape
    n_valid = int(pred.size)
    if reduction not in ("mean", "sum"):
        # TODO(synk): reduction='none' would need a full elementwise-output
        # kernel; BCEWithLogitsLoss default reduction is 'mean'.
        raise NotImplementedError("reduction='none' not implemented")

    # Flatten to a lane-dense 2D slab.  Only pad to the next 1024-element
    # boundary (usually zero); padded logits (-1e4, target 0) give exactly 0.
    block_elems = SUBLANES * LANES
    n_pad = (-n_valid) % block_elems
    pred_flat = pred.reshape(-1)
    true_flat = true.reshape(-1)
    if n_pad:
        pred_flat = jnp.pad(pred_flat, (0, n_pad), constant_values=-1e4)
        true_flat = jnp.pad(true_flat, (0, n_pad), constant_values=0)
    m_rows = (n_valid + n_pad) // LANES            # multiple of 8
    pred2d = pred_flat.reshape(m_rows, LANES)      # native dtype; cast in-kernel
    true2d = true_flat.reshape(m_rows, LANES)

    # Tile sizing: 4096 rows for 32-bit inputs, 8192 rows for 16-bit inputs ->
    # 2 MiB per input block, 8 MiB double-buffered total; safe on 64 MiB v7x.
    in_bytes = max(jnp.dtype(pred2d.dtype).itemsize,
                   jnp.dtype(true2d.dtype).itemsize)
    max_tile_rows = 8192 if in_bytes <= 2 else 4096
    row_tile = min(max_tile_rows, m_rows)
    total_steps = pl.cdiv(m_rows, row_tile)

    # Partial 0 owns blocks [0, steps_per_part); partial 1 owns the LAST
    # steps_per_part blocks (never out of range).  An odd step count makes the
    # ranges overlap by one block; the edge-gated row mask de-dups it.
    if num_partials is None:
        num_partials = 2 if (total_steps >= 2 and _num_tensorcores() >= 2) else 1
    num_partials = max(1, min(2, int(num_partials)))
    steps_per_part = pl.cdiv(total_steps, num_partials)
    part_stride = total_steps - steps_per_part     # 0 when num_partials == 1
    row_boundary = steps_per_part * row_tile
    need_mask = (m_rows % row_tile != 0) or (total_steps % num_partials != 0)

    kernel = functools.partial(
        _focal_loss_kernel, gamma=float(gamma), alpha=float(alpha),
        row_tile=row_tile, part_stride=part_stride, row_boundary=row_boundary,
        total_rows=m_rows, need_mask=need_mask)

    in_spec = pl.BlockSpec((row_tile, LANES),
                           lambda c, i: (c * part_stride + i, 0))

    partials = pl.pallas_call(
        kernel,
        out_shape=jax.ShapeDtypeStruct((num_partials * SUBLANES, LANES),
                                       jnp.float32),
        grid_spec=pltpu.PrefetchScalarGridSpec(
            num_scalar_prefetch=0,
            grid=(num_partials, steps_per_part),
            in_specs=[in_spec, in_spec],
            out_specs=pl.BlockSpec((SUBLANES, LANES), lambda c, i: (c, 0)),
        ),
        compiler_params=pltpu.CompilerParams(
            dimension_semantics=("parallel", "arbitrary"),
            vmem_limit_bytes=VMEM_LIMIT_BYTES),
    )(pred2d, true2d)

    total = jnp.sum(partials)                      # single tiny cross-lane reduce
    if reduction == "mean":
        return total / jnp.float32(n_valid)
    return total


def _focal_loss_ref(pred, true, gamma=1.5, alpha=0.25):
    x = pred.astype(jnp.float32)
    t = true.astype(jnp.float32)
    bce = jnp.maximum(x, 0.0) - x * t + jnp.log1p(jnp.exp(-jnp.abs(x)))
    p = jax.nn.sigmoid(x)
    p_t = t * p + (1 - t) * (1 - p)
    alpha_factor = t * alpha + (1 - t) * (1 - alpha)
    loss = bce * alpha_factor * (1.0 - p_t) ** gamma
    return loss.mean()


if __name__ == "__main__":
    key = jax.random.PRNGKey(0)
    keys = jax.random.split(key, 8)

    # Tolerance: rtol 1e-4 accommodates the EUP approx-reciprocal (+1 Newton
    # step) sigmoid path; real bugs show errors orders of magnitude larger.
    def check(out, ref, name):
        assert jnp.allclose(out, ref, rtol=1e-4, atol=1e-6), (name, out, ref)

    # 1) Canonical small NCHW head: aligned, single small block.
    pred = jax.random.normal(keys[0], (2, 4, 16, 16), dtype=jnp.float32) * 2.0
    true = (jax.random.uniform(keys[1], (2, 4, 16, 16)) > 0.7).astype(jnp.float32)
    out = jax.block_until_ready(focal_loss(pred, true))
    check(out, _focal_loss_ref(pred, true), "nchw_f32")

    # 2) bf16 inputs, single larger block with a ragged (96-row) tail chunk.
    pred_b = (jax.random.normal(keys[2], (1, 3, 320, 320)) * 3.0).astype(jnp.bfloat16)
    true_b = (jax.random.uniform(keys[3], (1, 3, 320, 320)) > 0.8).astype(jnp.bfloat16)
    out_b = jax.block_until_ready(focal_loss(pred_b, true_b))
    check(out_b, _focal_loss_ref(pred_b, true_b), "bf16")

    # 3) Unaligned element count -> exercises the zero-loss wrapper padding.
    pred_u = jax.random.normal(keys[4], (2, 3, 7, 5), dtype=jnp.float32)
    true_u = (jax.random.uniform(keys[5], (2, 3, 7, 5)) > 0.5).astype(jnp.float32)
    out_u = jax.block_until_ready(focal_loss(pred_u, true_u))
    check(out_u, _focal_loss_ref(pred_u, true_u), "pad")

    # 4) Multi-block, ragged last block, forced 2-partial split -> exercises the
    #    edge-gated mask and the overlap-block de-dup on any chip generation.
    pred_m = jax.random.normal(keys[6], (2, 8, 256, 320), dtype=jnp.float32)
    true_m = (jax.random.uniform(keys[7], (2, 8, 256, 320)) > 0.6).astype(jnp.float32)
    out_m = jax.block_until_ready(focal_loss(pred_m, true_m, num_partials=2))
    check(out_m, _focal_loss_ref(pred_m, true_m), "multi_block")

    # 4b) Same tensors through the auto-partial path with reduction='sum'.
    out_s = jax.block_until_ready(focal_loss(pred_m, true_m, reduction="sum"))
    ref_s = _focal_loss_ref(pred_m, true_m) * jnp.float32(pred_m.size)
    assert jnp.allclose(out_s, ref_s, rtol=1e-4), (out_s, ref_s)

    print("KERNEL_OK")
</pallas_src>

<mosaic_0001>
module attributes {stable_mosaic.version = 11 : i64} {
  func.func @_focal_loss_kernel(%arg0: i32, %arg1: i32, %arg2: memref<16x128xf32, #tpu.memory_space<vmem>>, %arg3: memref<16x128xf32, #tpu.memory_space<vmem>>, %arg4: memref<8x128xf32, #tpu.memory_space<vmem>>) attributes {dimension_semantics = [#tpu.dimension_semantics<parallel>, #tpu.dimension_semantics<arbitrary>], iteration_bounds = array<i64: 1, 1>, scalar_prefetch = 0 : i64, scratch_operands = 0 : i64, tpu.core_type = #tpu.core_type<tc>, window_params = [{transform_indices = @transform_0, window_bounds = array<i64: 16, 128>}, {transform_indices = @transform_1, window_bounds = array<i64: 16, 128>}, {transform_indices = @transform_2, window_bounds = array<i64: 8, 128>}]} {
    %c0_i32 = arith.constant 0 : i32
    %0 = arith.cmpi eq, %arg1, %c0_i32 : i32
    %1 = arith.extui %0 : i1 to i32
    %c0_i32_0 = arith.constant 0 : i32
    %2 = arith.cmpi ne, %1, %c0_i32_0 : i32
    scf.if %2 {
      %cst_19 = arith.constant 0.000000e+00 : f32
      %49 = vector.broadcast %cst_19 : f32 to vector<8x128xf32>
      %c0_20 = arith.constant 0 : index
      %c0_21 = arith.constant 0 : index
      %50 = vector.load %arg4[%c0_20, %c0_21] : memref<8x128xf32, #tpu.memory_space<vmem>>, vector<8x128xf32>
      tpu.vector_store %arg4[%c0_20, %c0_21], %49 {strides = array<i32>} : memref<8x128xf32, #tpu.memory_space<vmem>>, vector<8x128xf32>,
    } else {
    }
    %c0 = arith.constant 0 : index
    %c0_1 = arith.constant 0 : index
    %3 = vector.load %arg4[%c0, %c0_1] : memref<8x128xf32, #tpu.memory_space<vmem>>, vector<8x128xf32>
    %cst = arith.constant 0.000000e+00 : f32
    %4 = vector.broadcast %cst : f32 to vector<8x128xf32>
    %c0_2 = arith.constant 0 : index
    %c0_3 = arith.constant 0 : index
    %5 = vector.load %arg2[%c0_2, %c0_3] : memref<16x128xf32, #tpu.memory_space<vmem>>, vector<16x128xf32>
    %c0_4 = arith.constant 0 : index
    %c0_5 = arith.constant 0 : index
    %6 = vector.load %arg3[%c0_4, %c0_5] : memref<16x128xf32, #tpu.memory_space<vmem>>, vector<16x128xf32>
    %7 = math.absf %5 : vector<16x128xf32>
    %cst_6 = arith.constant 0.000000e+00 : f32
    %8 = vector.broadcast %cst_6 : f32 to vector<16x128xf32>
    %9 = arith.subf %8, %7 : vector<16x128xf32>
    %10 = math.exp %9 : vector<16x128xf32>
    %cst_7 = arith.constant 0.000000e+00 : f32
    %11 = vector.broadcast %cst_7 : f32 to vector<16x128xf32>
    %12 = arith.maximumf %5, %11 : vector<16x128xf32>
    %13 = arith.mulf %5, %6 : vector<16x128xf32>
    %14 = arith.subf %12, %13 : vector<16x128xf32>
    %15 = math.log1p %10 : vector<16x128xf32>
    %16 = arith.addf %14, %15 : vector<16x128xf32>
    %cst_8 = arith.constant 1.000000e+00 : f32
    %17 = vector.broadcast %cst_8 : f32 to vector<16x128xf32>
    %18 = arith.addf %17, %10 : vector<16x128xf32>
    %19 = tpu.reciprocal %18 {approx = true} : vector<16x128xf32> -> vector<16x128xf32>
    %20 = arith.mulf %18, %19 : vector<16x128xf32>
    %cst_9 = arith.constant 2.000000e+00 : f32
    %21 = vector.broadcast %cst_9 : f32 to vector<16x128xf32>
    %22 = arith.subf %21, %20 : vector<16x128xf32>
    %23 = arith.mulf %19, %22 : vector<16x128xf32>
    %cst_10 = arith.constant 0.000000e+00 : f32
    %24 = vector.broadcast %cst_10 : f32 to vector<16x128xf32>
    %25 = arith.cmpf oge, %5, %24 : vector<16x128xf32>
    %cst_11 = arith.constant 1.000000e+00 : f32
    %26 = vector.broadcast %cst_11 : f32 to vector<16x128xf32>
    %27 = arith.select %25, %26, %10 : vector<16x128xi1>, vector<16x128xf32>
    %28 = arith.mulf %27, %23 : vector<16x128xf32>
    %29 = arith.addf %28, %6 : vector<16x128xf32>
    %30 = arith.mulf %6, %28 : vector<16x128xf32>
    %cst_12 = arith.constant 2.000000e+00 : f32
    %31 = vector.broadcast %cst_12 : f32 to vector<16x128xf32>
    %32 = arith.mulf %31, %30 : vector<16x128xf32>
    %33 = arith.subf %29, %32 : vector<16x128xf32>
    %cst_13 = arith.constant 0.000000e+00 : f32
    %34 = vector.broadcast %cst_13 : f32 to vector<16x128xf32>
    %35 = arith.maximumf %33, %34 : vector<16x128xf32>
    %cst_14 = arith.constant -5.000000e-01 : f32
    %36 = vector.broadcast %cst_14 : f32 to vector<16x128xf32>
    %37 = arith.mulf %6, %36 : vector<16x128xf32>
    %cst_15 = arith.constant 7.500000e-01 : f32
    %38 = vector.broadcast %cst_15 : f32 to vector<16x128xf32>
    %39 = arith.addf %38, %37 : vector<16x128xf32>
    %40 = arith.mulf %16, %39 : vector<16x128xf32>
    %41 = math.sqrt %35 : vector<16x128xf32>
    %42 = arith.mulf %35, %41 : vector<16x128xf32>
    %43 = arith.mulf %40, %42 : vector<16x128xf32>
    %44 = vector.shape_cast %43 : vector<16x128xf32> to vector<2x8x128xf32>
    %cst_16 = arith.constant dense<0.000000e+00> : vector<8x128xf32>
    %45 = vector.multi_reduction <add>, %44, %cst_16 [0] : vector<2x8x128xf32> to vector<8x128xf32>
    %46 = arith.addf %4, %45 : vector<8x128xf32>
    %47 = arith.addf %3, %46 : vector<8x128xf32>
    %c0_17 = arith.constant 0 : index
    %c0_18 = arith.constant 0 : index
    %48 = vector.load %arg4[%c0_17, %c0_18] : memref<8x128xf32, #tpu.memory_space<vmem>>, vector<8x128xf32>
    tpu.vector_store %arg4[%c0_17, %c0_18], %47 {strides = array<i32>} : memref<8x128xf32, #tpu.memory_space<vmem>>, vector<8x128xf32>,
    return
  }
  func.func @transform_0(%arg0: i32, %arg1: i32) -> (i32, i32) {
    %c0_i32 = arith.constant 0 : i32
    %0 = arith.muli %arg0, %c0_i32 : i32
    %1 = arith.addi %0, %arg1 : i32
    %c0_i32_0 = arith.constant 0 : i32
    %c0_i32_1 = arith.constant 0 : i32
    return %1, %c0_i32_0 : i32, i32
  }
  func.func @transform_1(%arg0: i32, %arg1: i32) -> (i32, i32) {
    %c0_i32 = arith.constant 0 : i32
    %0 = arith.muli %arg0, %c0_i32 : i32
    %1 = arith.addi %0, %arg1 : i32
    %c0_i32_0 = arith.constant 0 : i32
    %c0_i32_1 = arith.constant 0 : i32
    return %1, %c0_i32_0 : i32, i32
  }
  func.func @transform_2(%arg0: i32, %arg1: i32) -> (i32, i32) {
    %c0_i32 = arith.constant 0 : i32
    %c0_i32_0 = arith.constant 0 : i32
    return %arg0, %c0_i32 : i32, i32
  }
}

</mosaic_0001>

<bundles_post_ra>
// kernel: tpu_custom_call.1
= control target key start
LH: loop header
LB: loop body
LE: loop exit
PB: predicated region body
PF: predicated region fallthrough
CT: control target
= control target key end

     0   :  { %7 = vsyncpa [#allocation3], 0  ;;  %s316_s0 = inlined_call_operand.hbm [shape: f32[16,128], index: 0, kind: input, shape index: {}]   ;;  %s317_s1 = inlined_call_operand.hbm [shape: f32[16,128], index: 1, kind: input, shape index: {}]   ;;  %s318_s2 = inlined_call_operand.hbm [shape: f32[8,128], index: 2, kind: output, shape index: {}]  }
   0x1   :  { %8 = vsyncpa [#allocation6], 0 }
   0x2   :  { %9 = vsyncpa [#allocation4], 0  ;;  %s248_s9 = smov [#allocation2]   ;;  %s176_s13 = scalar_lea.hbm %s316_s0, 256 }
   0x3   :  { %s15_s10 = sshll.u32 %s248_s9, 4  ;;  %p177_p0 = scmp.ne.s32.totalorder %s316_s0, %s176_s13  ;;  %s16_s10 = int_to_ptr.vmem [resolvable:$true] %s15_s10 }
   0x4   :  { %p180_p1 = scmp.lt.u32.totalorder %s176_s13, %s316_s0 }
   0x6   :  { %p182_p2 = pnand %p180_p1, %p177_p0 }
   0x8   :  { %185 = shalt.err (!%p182_p2)
}
   0x9   :  { %s186_s18 = scalar_lea.vmem %s16_s10, 256  ;;  %p191_p4 = scmp.lt.s32.totalorder %s16_s10, %s16_s10 }
   0xa   :  { %p187_p3 = scmp.ne.s32.totalorder %s16_s10, %s186_s18  ;;  %p192_p5 = scmp.lt.s32.totalorder %s186_s18, %s186_s18 }
   0xc   :  { %p193_p6 = por %p192_p5, %p191_p4 }
   0xe   :  { %p194_p7 = pnand %p193_p6, %p187_p3 }
  0x10   :  { %197 = shalt.err (!%p194_p7)
}
  0x11   :  { %s249_s19 = smov 128   ;;  %s250_s20 = smov 8  }
  0x12   :  { %21 = dma.hbm_to_vmem [thread:$0]  %s316_s0, 256, %s16_s10, [#allocation3], %s249_s19, %s249_s19, %s250_s20  }
  0x13   :  { %s251_s23 = smov [#allocation5]   ;;  %s198_s27 = scalar_lea.hbm %s317_s1, 256 }
  0x14   :  { %s27_s24 = sshll.u32 %s251_s23, 4  ;;  %p199_p8 = scmp.ne.s32.totalorder %s317_s1, %s198_s27  ;;  %s28_s24 = int_to_ptr.vmem [resolvable:$true] %s27_s24 }
  0x15   :  { %p202_p9 = scmp.lt.u32.totalorder %s198_s27, %s317_s1 }
  0x17   :  { %p204_p10 = pnand %p202_p9, %p199_p8 }
  0x19   :  { %207 = shalt.err (!%p204_p10)
}
  0x1a   :  { %s208_s4 = scalar_lea.vmem %s28_s24, 256  ;;  %p213_p12 = scmp.lt.s32.totalorder %s28_s24, %s28_s24 }
  0x1b   :  { %p209_p11 = scmp.ne.s32.totalorder %s28_s24, %s208_s4  ;;  %p214_p13 = scmp.lt.s32.totalorder %s208_s4, %s208_s4 }
  0x1d   :  { %p215_p0 = por %p214_p13, %p213_p12 }
  0x1f   :  { %p216_p1 = pnand %p215_p0, %p209_p11 }
  0x21   :  { %219 = shalt.err (!%p216_p1)
}
  0x22   :  { %33 = dma.hbm_to_vmem [thread:$0]  %s317_s1, 256, %s28_s24, [#allocation6], %s249_s19, %s249_s19, %s250_s20  }
  0x23   :  { %242 = dma.done.wait [#allocation3], 256  }
  0x24   :  { %243 = vsyncadd [#allocation3], 4294967040 }
  0x25   :  { %244 = dma.done.wait [#allocation6], 256  }
  0x26   :  { %245 = vsyncadd [#allocation6], 4294967040  ;;  %v292_v0 = vld [vmem:[#allocation2] sm:$0xff]  ;;  %v294_v1 = vld [vmem:[#allocation2 + $0x8] sm:$0xff]  ;;  %s252_s1 = smov [#allocation7]  }
  0x27   :  { %v50_v2 = vand.u32 2147483647, %v292_v0  ;;  %v51_v3 = vand.u32 2147483647, %v294_v1  ;;  %vm94_vm0 = vcmp.ge.f32.partialorder %v292_v0, 0.0  ;;  %vm95_vm1 = vcmp.ge.f32.partialorder %v294_v1, 0.0 }
  0x28   :  { %v48_v21 = vld [vmem:[#allocation5] sm:$0xff]  ;;  %v49_v23 = vld [vmem:[#allocation5 + $0x8] sm:$0xff]  ;;  %v58_v44 = vmax.f32 %v292_v0, 0.0  ;;  %v59_v46 = vmax.f32 %v294_v1, 0.0  ;;  %s144_s6 = sshll.u32 %s252_s1, 4  ;;  %s145_s6 = int_to_ptr.vmem [resolvable:$true] %s144_s6 }
  0x29   :  { %v52_v4 = vsub.f32 0.0, %v50_v2  ;;  %v53_v5 = vsub.f32 0.0, %v51_v3  ;;  %v60_v45 = vmul.f32 %v48_v21, %v292_v0  ;;  %v61_v47 = vmul.f32 %v49_v23, %v294_v1  ;;  %s220_s7 = scalar_lea.vmem %s145_s6, 128  ;;  %p225_p3 = scmp.lt.s32.totalorder %s145_s6, %s145_s6 }
  0x2a   :  { %v110_v53 = vmul.f32 -0.5, %v48_v21  ;;  %v111_v56 = vmul.f32 -0.5, %v49_v23  ;;  %p221_p2 = scmp.ne.s32.totalorder %s145_s6, %s220_s7  ;;  %p226_p4 = scmp.lt.s32.totalorder %s220_s7, %s220_s7 }
  0x2b   :  { %v54_v6 = vmul.f32 1.442695, %v52_v4  ;;  %v56_v7 = vmul.f32 1.442695, %v53_v5  ;;  %v62_v52 = vsub.f32 %v58_v44, %v60_v45  ;;  %v63_v54 = vsub.f32 %v59_v46, %v61_v47 }
  0x2c   :  { %v112_v59 = vadd.f32 0.75, %v110_v53  ;;  %v113_v62 = vadd.f32 0.75, %v111_v56  ;;  %p227_p5 = por %p226_p4, %p225_p3 }
  0x2d   :  { %160 = vpow2.f32 %v54_v6 }
  0x2e   :  { %162 = vpow2.f32 %v56_v7  ;;  %p228_p6 = pnand %p227_p5, %p221_p2 }
  0x37   :  { %v161_v8 = vpop.eup %160 }
  0x38   :  { %v163_v9 = vpop.eup %162  ;;  %v64_v10 = vadd.f32 1.0, %v161_v8  ;;  %v96_v18 = vsel %vm94_vm0, 1.0, %v161_v8  ;;  %v67_v30 = vmul.f32 -0.5, %v161_v8  ;;  %v70_v39 = vand.u32 2147483647, %v161_v8 }
  0x39   :  { %v73_v11 = vadd.f32 1.0, %v163_v9  ;;  %v97_v20 = vsel %vm95_vm1, 1.0, %v163_v9  ;;  %v76_v32 = vmul.f32 -0.5, %v163_v9  ;;  %v79_v43 = vand.u32 2147483647, %v163_v9 }
  0x3a   :  { %164 = vrcp.f32 %v64_v10  ;;  %v68_v36 = vadd.f32 1.0, %v67_v30  ;;  %vm71_vm2 = vcmp.lt.f32.partialorder %v70_v39, 0.0004427343 }
  0x3b   :  { %166 = vrcp.f32 %v73_v11  ;;  %v77_v40 = vadd.f32 1.0, %v76_v32  ;;  %vm80_vm3 = vcmp.lt.f32.partialorder %v79_v43, 0.0004427343 }
  0x3c   :  { %168 = vlog2.f32 %v64_v10  ;;  %v69_v49 = vmul.f32 %v161_v8, %v68_v36 }
  0x3d   :  { %170 = vlog2.f32 %v73_v11  ;;  %v78_v51 = vmul.f32 %v163_v9, %v77_v40 }
  0x44   :  { %v165_v12 = vpop.eup %164 }
  0x45   :  { %v167_v13 = vpop.eup %166  ;;  %v88_v14 = vmul.f32 %v165_v12, %v64_v10 }
  0x46   :  { %v89_v15 = vmul.f32 %v167_v13, %v73_v11  ;;  %v169_v38 = vpop.eup %168 }
  0x47   :  { %v90_v16 = vsub.f32 2.0, %v88_v14  ;;  %v171_v42 = vpop.eup %170  ;;  %v66_v48 = vmul.f32 0.6931472, %v169_v38 }
  0x48   :  { %v91_v17 = vsub.f32 2.0, %v89_v15  ;;  %v75_v50 = vmul.f32 0.6931472, %v171_v42 }
  0x49   :  { %v92_v19 = vmul.f32 %v165_v12, %v90_v16  ;;  %v72_v55 = vsel %vm71_vm2, %v69_v49, %v66_v48 }
  0x4a   :  { %v93_v22 = vmul.f32 %v167_v13, %v91_v17  ;;  %v81_v57 = vsel %vm80_vm3, %v78_v51, %v75_v50  ;;  %v82_v58 = vadd.f32 %v72_v55, %v62_v52 }
  0x4b   :  { %v98_v24 = vmul.f32 %v96_v18, %v92_v19  ;;  %v83_v61 = vadd.f32 %v81_v57, %v63_v54 }
  0x4c   :  { %v99_v25 = vmul.f32 %v97_v20, %v93_v22  ;;  %v114_v4 = vmul.f32 %v112_v59, %v82_v58 }
  0x4d   :  { %v100_v26 = vadd.f32 %v98_v24, %v48_v21  ;;  %v102_v27 = vmul.f32 %v98_v24, %v48_v21  ;;  %v115_v6 = vmul.f32 %v113_v62, %v83_v61 }
  0x4e   :  { %v101_v28 = vadd.f32 %v99_v25, %v49_v23  ;;  %v103_v29 = vmul.f32 %v99_v25, %v49_v23 }
  0x4f   :  { %v104_v31 = vmul.f32 2.0, %v102_v27 }
  0x50   :  { %v105_v33 = vmul.f32 2.0, %v103_v29 }
  0x51   :  { %v106_v34 = vsub.f32 %v100_v26, %v104_v31 }
  0x52   :  { %v107_v35 = vsub.f32 %v101_v28, %v105_v33 }
  0x53   :  { %v108_v37 = vmax.f32 %v106_v34, 0.0 }
  0x54   :  { %v109_v41 = vmax.f32 %v107_v35, 0.0 }
  0x55   :  { %172 = vrsqrt.f32 %v108_v37  ;;  %vm118_vm4 = vcmp.eq.f32.partialorder %v108_v37, inf  ;;  %v121_v63 = vand.u32 2147483648, %v108_v37  ;;  %vm120_vm5 = vcmp.eq.f32.partialorder %v108_v37, 0.0 }
  0x56   :  { %174 = vrsqrt.f32 %v109_v41  ;;  %vm125_vm6 = vcmp.eq.f32.partialorder %v109_v41, inf  ;;  %v128_v2 = vand.u32 2147483648, %v109_v41  ;;  %vm127_vm7 = vcmp.eq.f32.partialorder %v109_v41, 0.0 }
  0x5f   :  { %v173_v60 = vpop.eup %172 }
  0x60   :  { %v175_v0 = vpop.eup %174  ;;  %v117_v1 = vmul.f32 %v173_v60, %v108_v37 }
  0x61   :  { %v124_v3 = vmul.f32 %v175_v0, %v109_v41 }
  0x62   :  { %v119_v5 = vsel %vm118_vm4, %v108_v37, %v117_v1 }
  0x63   :  { %v122_v7 = vsel %vm120_vm5, %v121_v63, %v119_v5  ;;  %v126_v8 = vsel %vm125_vm6, %v109_v41, %v124_v3 }
  0x64   :  { %v129_v9 = vsel %vm127_vm7, %v128_v2, %v126_v8  ;;  %v130_v10 = vmul.f32 %v122_v7, %v108_v37 }
  0x65   :  { %v131_v11 = vmul.f32 %v129_v9, %v109_v41 }
  0x66   :  { %v132_v12 = vmul.f32 %v130_v10, %v114_v4 }
  0x67   :  { %v133_v13 = vmul.f32 %v131_v11, %v115_v6 }
  0x69   :  { %v134_v14 = vadd.f32 %v133_v13, %v132_v12 }
  0x6b   :  { %137 = vst [vmem:[#allocation7] sm:$0xff] %v134_v14 }
  0x6c   :  { %231 = shalt.err (!%p228_p6)
}
  0x6d   :  { %s232_s10 = scalar_lea.hbm %s318_s2, 128 }
  0x6e   :  { %p233_p7 = scmp.ne.s32.totalorder %s318_s2, %s232_s10  ;;  %p236_p8 = scmp.lt.u32.totalorder %s232_s10, %s318_s2 }
  0x70   :  { %p238_p9 = pnand %p236_p8, %p233_p7 }
  0x72   :  { %241 = shalt.err (!%p238_p9)
}
  0x73   :  { %147 = dma.vmem_to_hbm [thread:$0]  %s145_s6, 128, %s318_s2, [#allocation4]  }
  0x74   :  { %246 = dma.done.wait [#allocation4], 128  }
  0x75   :  { %247 = vsyncadd [#allocation4], 4294967168 }
  0x76   :  { %151 = vsyncpa [#allocation3], 1 }
  0x77   :  { %152 = vsyncpa [#allocation6], 1 }
  0x78   :  { %153 = vsyncpa [#allocation4], 1 }

</bundles_post_ra>
